<compile_context>
chip_gen: v5e
topology: v5e:2x2
jax: 0.10.0
libtpu: 0.0.40
codegen_flags: <defaults>
</compile_context>

<pallas_src>
import jax
import jax.numpy as jnp
from jax.experimental import pallas as pl
from jax.experimental.pallas import tpu as pltpu

_EPS = 1e-8


def _gamma_kernel(gamma_ref, img_ref, out_ref):
    # gamma_ref: (TILE_ROWS, 1) f32 per-row gamma (broadcast across lanes)
    # img_ref / out_ref: (TILE_ROWS, LANE) lane-dense tile
    x = img_ref[...].astype(jnp.float32)
    x = jnp.maximum(x, _EPS)                    # clamp so log() is well-defined
    y = jnp.exp(gamma_ref[...] * jnp.log(x))    # x ** gamma (EUP transcendentals)
    out_ref[...] = y.astype(out_ref.dtype)


def _round_up(x, m):
    return (x + m - 1) // m * m


def _pick_lane(total, max_lane=1024):
    """Largest multiple of 128 (<= max_lane) that divides `total`; 0 if none."""
    best = 0
    cand = 128
    while cand <= min(max_lane, total):
        if total % cand == 0:
            best = cand
        cand += 128
    return best


def gamma_forward(img, params, *, tile_bytes=2 * 1024 * 1024):
    """
    img:    (N, C, H, W) float array
    params: (N, 1) float array (gamma per image)
    returns (N, C, H, W) array, same dtype as img
    """
    N = img.shape[0]
    total = 1
    for d in img.shape[1:]:
        total *= int(d)
    itemsize = jnp.dtype(img.dtype).itemsize

    img_flat = img.reshape(N, total)
    lane = _pick_lane(total)
    if lane == 0:
        # TODO(synk): rare fallback when C*H*W has no multiple-of-128 divisor;
        # minimal (<128 elem/image) pad + slice around the kernel.
        total_eff = _round_up(total, 128)
        img_flat = jnp.pad(
            img_flat, ((0, 0), (0, total_eff - total)), constant_values=1.0
        )
        lane = _pick_lane(total_eff)
    else:
        total_eff = total

    rows_per_img = total_eff // lane
    R = N * rows_per_img
    img_slab = img_flat.reshape(R, lane)          # contiguous reshape, no copy

    # Tiny per-row gamma column (R * 4 bytes): lets one grid axis span the batch.
    gamma_col = jnp.repeat(
        params.reshape(N).astype(jnp.float32), rows_per_img
    ).reshape(R, 1)

    # ~tile_bytes per tile, rows a multiple of 8; full slab if it already fits.
    tile_rows = max(tile_bytes // (lane * itemsize), 8) // 8 * 8
    if tile_rows >= R:
        tile_rows = R                              # full-extent block (always legal)
    num_tiles = pl.cdiv(R, tile_rows)              # ragged tail masked by Pallas

    n_elems = N * total
    cost = pl.CostEstimate(
        flops=2 * n_elems,
        transcendentals=2 * n_elems,
        bytes_accessed=2 * n_elems * itemsize + R * 4,
    )

    out_slab = pl.pallas_call(
        _gamma_kernel,
        out_shape=jax.ShapeDtypeStruct((R, lane), img.dtype),
        grid=(num_tiles,),
        in_specs=[
            pl.BlockSpec((tile_rows, 1), lambda i: (i, 0)),
            pl.BlockSpec((tile_rows, lane), lambda i: (i, 0)),
        ],
        out_specs=pl.BlockSpec((tile_rows, lane), lambda i: (i, 0)),
        compiler_params=pltpu.CompilerParams(
            dimension_semantics=("parallel",),
            vmem_limit_bytes=32 * 1024 * 1024,
        ),
        cost_estimate=cost,
    )(gamma_col, img_slab)

    out = out_slab.reshape(N, total_eff)
    if total_eff != total:
        out = out[:, :total]
    return out.reshape(img.shape)


if __name__ == "__main__":
    key = jax.random.PRNGKey(0)
    k_img, k_gamma = jax.random.split(key)

    N, C, H, W = 2, 4, 16, 16
    # image values in [0, 1] like normalized pixels
    img = jax.random.uniform(k_img, (N, C, H, W), dtype=jnp.float32)
    # gamma values around 1.0 (e.g. in [0.5, 2.0])
    gamma = jax.random.uniform(
        k_gamma, (N, 1), dtype=jnp.float32, minval=0.5, maxval=2.0
    )

    fwd = jax.jit(gamma_forward)
    out = jax.block_until_ready(fwd(img, gamma))

    # reference check in plain JAX
    ref = jnp.power(jnp.maximum(img, _EPS), gamma.reshape(N, 1, 1, 1))
    assert out.shape == (N, C, H, W)
    assert out.dtype == img.dtype
    assert jnp.allclose(out, ref, atol=1e-5, rtol=1e-5)

    print("KERNEL_OK")
</pallas_src>

<mosaic_0001>
module attributes {stable_mosaic.version = 11 : i64} {
  func.func @_gamma_kernel(%arg0: i32, %arg1: memref<2x1xf32, #tpu.memory_space<vmem>>, %arg2: memref<2x1024xf32, #tpu.memory_space<vmem>>, %arg3: memref<2x1024xf32, #tpu.memory_space<vmem>>) attributes {dimension_semantics = [#tpu.dimension_semantics<parallel>], iteration_bounds = array<i64: 1>, scalar_prefetch = 0 : i64, scratch_operands = 0 : i64, tpu.core_type = #tpu.core_type<tc>, window_params = [{transform_indices = @transform_0, window_bounds = array<i64: 2, 1>}, {transform_indices = @transform_1, window_bounds = array<i64: 2, 1024>}, {transform_indices = @transform_2, window_bounds = array<i64: 2, 1024>}]} {
    %c0 = arith.constant 0 : index
    %c0_0 = arith.constant 0 : index
    %0 = vector.load %arg2[%c0, %c0_0] : memref<2x1024xf32, #tpu.memory_space<vmem>>, vector<2x1024xf32>
    %cst = arith.constant 9.99999993E-9 : f32
    %1 = vector.broadcast %cst : f32 to vector<2x1024xf32>
    %2 = arith.maximumf %0, %1 : vector<2x1024xf32>
    %c0_1 = arith.constant 0 : index
    %c0_2 = arith.constant 0 : index
    %3 = vector.load %arg1[%c0_1, %c0_2] : memref<2x1xf32, #tpu.memory_space<vmem>>, vector<2x1xf32>
    %4 = math.log %2 : vector<2x1024xf32>
    %5 = vector.broadcast %3 : vector<2x1xf32> to vector<2x1024xf32>
    %6 = arith.mulf %5, %4 : vector<2x1024xf32>
    %7 = math.exp %6 : vector<2x1024xf32>
    %c0_3 = arith.constant 0 : index
    %c0_4 = arith.constant 0 : index
    %8 = vector.load %arg3[%c0_3, %c0_4] : memref<2x1024xf32, #tpu.memory_space<vmem>>, vector<2x1024xf32>
    tpu.vector_store %arg3[%c0_3, %c0_4], %7 {strides = array<i32>} : memref<2x1024xf32, #tpu.memory_space<vmem>>, vector<2x1024xf32>,
    return
  }
  func.func @transform_0(%arg0: i32) -> (i32, i32) {
    %c0_i32 = arith.constant 0 : i32
    %c0_i32_0 = arith.constant 0 : i32
    return %arg0, %c0_i32 : i32, i32
  }
  func.func @transform_1(%arg0: i32) -> (i32, i32) {
    %c0_i32 = arith.constant 0 : i32
    %c0_i32_0 = arith.constant 0 : i32
    return %arg0, %c0_i32 : i32, i32
  }
  func.func @transform_2(%arg0: i32) -> (i32, i32) {
    %c0_i32 = arith.constant 0 : i32
    %c0_i32_0 = arith.constant 0 : i32
    return %arg0, %c0_i32 : i32, i32
  }
}

</mosaic_0001>

<bundles_post_ra>
// kernel: gamma_forward.1
= control target key start
LH: loop header
LB: loop body
LE: loop exit
PB: predicated region body
PF: predicated region fallthrough
CT: control target
= control target key end

     0   :  { %v123_v0 = vmov 0   ;;  %vm84_vm0 = vcmask 1041408   ;;  %vm86_vm1 = vcmask 1045508   ;;  %vm88_vm2 = vcmask 1043456   ;;  %s158_s0 = inlined_call_operand.vmem [shape: f32[2,1], index: 0, kind: input, shape index: {}]   ;;  %s159_s1 = inlined_call_operand.vmem [shape: f32[2,1024], index: 1, kind: input, shape index: {}]   ;;  %s160_s2 = inlined_call_operand.vmem [shape: f32[2,1024], index: 2, kind: output, shape index: {}]  }
   0x1   :  { %102 = vset.pattern.permute.xlu0 %v123_v0  ;;  %v15_v1 = vld [vmem:[%s158_s0] sm:$0x3]  ;;  %v12_v3 = vld [vmem:[%s159_s1 + $0x8] sm:$0xff] }
   0x2   :  { %v11_v2 = vld [vmem:[%s159_s1] sm:$0xff]  ;;  %22 = vperm.xlu0 %102, %v15_v1   ;;  %v14_v5 = vmax.f32 %v12_v3, 1e-08 }
   0x3   :  { %v13_v4 = vmax.f32 %v11_v2, 1e-08 }
   0x5   :  { %103 = vlog2.f32 %v13_v4 }
   0x6   :  { %105 = vlog2.f32 %v14_v5 }
   0xb   :  { %v104_v6 = vpop.eup %103 }
   0xc   :  { %v106_v7 = vpop.eup %105  ;;  %v17_v8 = vmul.f32 0.6931472, %v104_v6 }
   0xd   :  { %v19_v9 = vmul.f32 0.6931472, %v106_v7 }
   0xe   :  { %27 = vst [vmem:[#allocation1] ss:$4 sm:$0xff] %v17_v8 }
   0xf   :  { %29 = vst [vmem:[#allocation1 + $0x20] ss:$4 sm:$0xff] %v19_v9 }
  0x15   :  { %v30_v10 = vld.sshfl [vmem:[#allocation1] sm:$0xff pattern:$0x73625140]  ;;  %v31_v11 = vld.sshfl [vmem:[#allocation1 + $0x8] sm:$0xff pattern:$0x73625140] }
  0x16   :  { %v32_v12 = vld.sshfl [vmem:[#allocation1 + $0x10] sm:$0xff pattern:$0x73625140]  ;;  %v33_v13 = vld.sshfl [vmem:[#allocation1 + $0x18] sm:$0xff pattern:$0x73625140] }
  0x17   :  { %v34_v14 = vld.sshfl [vmem:[#allocation1 + $0x20] sm:$0xff pattern:$0x73625140]  ;;  %v35_v15 = vld.sshfl [vmem:[#allocation1 + $0x28] sm:$0xff pattern:$0x73625140] }
  0x18   :  { %v36_v16 = vld.sshfl [vmem:[#allocation1 + $0x30] sm:$0xff pattern:$0x73625140]  ;;  %v37_v18 = vld.sshfl [vmem:[#allocation1 + $0x38] sm:$0xff pattern:$0x73625140] }
  0x74   :  { %v23_v17 = vpop.permute.xlu0 %22 }
  0x75   :  { %v46_v19 = vmul.f32 %v30_v10, %v23_v17  ;;  %v47_v20 = vmul.f32 %v31_v11, %v23_v17  ;;  %v48_v21 = vmul.f32 %v32_v12, %v23_v17  ;;  %v49_v22 = vmul.f32 %v33_v13, %v23_v17 }
  0x76   :  { %v50_v23 = vmul.f32 %v34_v14, %v23_v17  ;;  %v51_v24 = vmul.f32 %v35_v15, %v23_v17  ;;  %v52_v25 = vmul.f32 %v36_v16, %v23_v17  ;;  %v53_v29 = vmul.f32 %v37_v18, %v23_v17 }
  0x77   :  { %v54_v26 = vmul.f32 1.442695, %v46_v19  ;;  %v56_v27 = vmul.f32 1.442695, %v47_v20  ;;  %v58_v28 = vmul.f32 1.442695, %v48_v21 }
  0x78   :  { %v60_v30 = vmul.f32 1.442695, %v49_v22  ;;  %v62_v31 = vmul.f32 1.442695, %v50_v23  ;;  %v64_v32 = vmul.f32 1.442695, %v51_v24 }
  0x79   :  { %107 = vpow2.f32 %v54_v26  ;;  %v66_v33 = vmul.f32 1.442695, %v52_v25  ;;  %v68_v34 = vmul.f32 1.442695, %v53_v29 }
  0x7a   :  { %109 = vpow2.f32 %v56_v27 }
  0x7b   :  { %111 = vpow2.f32 %v58_v28 }
  0x7c   :  { %113 = vpow2.f32 %v60_v30 }
  0x7d   :  { %115 = vpow2.f32 %v62_v31 }
  0x7e   :  { %117 = vpow2.f32 %v64_v32 }
  0x7f   :  { %v108_v35 = vpop.eup %107  ;;  %119 = vpow2.f32 %v66_v33 }
  0x80   :  { %v110_v36 = vpop.eup %109  ;;  %121 = vpow2.f32 %v68_v34 }
  0x81   :  { %v112_v37 = vpop.eup %111  ;;  %v78_v38 = vrot.slane %v110_v36, 6 }
  0x82   :  { %v114_v39 = vpop.eup %113  ;;  %v79_v40 = vrot.slane %v112_v37, 4 }
  0x83   :  { %v116_v41 = vpop.eup %115  ;;  %v80_v42 = vrot.slane %v114_v39, 2  ;;  %v85_v43 = vsel %vm84_vm0, %v108_v35, %v78_v38 }
  0x84   :  { %v118_v44 = vpop.eup %117 }
  0x85   :  { %v120_v45 = vpop.eup %119  ;;  %v81_v46 = vrot.slane %v118_v44, 6  ;;  %v87_v47 = vsel %vm86_vm1, %v79_v40, %v80_v42 }
  0x86   :  { %v122_v48 = vpop.eup %121  ;;  %v82_v49 = vrot.slane %v120_v45, 4  ;;  %v89_v50 = vsel %vm88_vm2, %v85_v43, %v87_v47 }
  0x87   :  { %v83_v51 = vrot.slane %v122_v48, 2  ;;  %v90_v52 = vsel %vm84_vm0, %v116_v41, %v81_v46  ;;  %95 = vst [vmem:[%s160_s2] sm:$0xff] %v89_v50 }
  0x89   :  { %v91_v53 = vsel %vm86_vm1, %v82_v49, %v83_v51 }
  0x8a   :  { %v92_v54 = vsel %vm88_vm2, %v90_v52, %v91_v53 }
  0x8b   :  { %96 = vst [vmem:[%s160_s2 + $0x8] sm:$0xff] %v92_v54 }

</bundles_post_ra>
